<compile_context>
chip_gen: v5e
topology: v5e:2x2
jax: 0.10.0
libtpu: 0.0.40
codegen_flags: <defaults>
</compile_context>

<pallas_src>
import functools

import jax
import jax.numpy as jnp
from jax.experimental import pallas as pl
from jax.experimental.pallas import tpu as pltpu

K = 8  # JPEG block size (self.k in block_splitting)


def _block_split_kernel(x_ref, y_ref, cb_ref, cr_ref, *, rb, wb):
    # x_ref:  (1, 3, rb, K, W)   rb 8-row block-rows of all 3 channels
    # o_ref:  (1, rb, W*K)       lane-dense row of 8x8 blocks per channel
    for c, o_ref in enumerate((y_ref, cb_ref, cr_ref)):
        for r in range(K):
            # All rows of channel c whose in-block row offset is r:
            # one sublane-strided, lane-dense load of shape (rb, W).
            rows = x_ref[0, c, :, r, :]
            for j in range(wb):
                dst = j * K * K + r * K
                o_ref[0, :, dst:dst + K] = rows[:, j * K:(j + 1) * K]


def _pick_rb(hb, w, itemsize, vmem_budget_bytes=8 * 1024 * 1024):
    """Largest number of 8-row block-rows per grid step that fits the VMEM budget."""
    # Per block-row per step: input slab (3*K*w) + 3 output slabs (3*K*w),
    # double-buffered by the Pallas pipeline.
    bytes_per_block_row = 2 * (3 * K * w + 3 * K * w) * itemsize
    max_rb = max(1, vmem_budget_bytes // bytes_per_block_row)
    divisors = [d for d in range(1, hb + 1) if hb % d == 0 and d <= max_rb]
    # Prefer rb that keeps the out block's second-minor dim 8-aligned (or full).
    aligned = [d for d in divisors if d == hb or d % 8 == 0]
    return max(aligned) if aligned else max(divisors)


def ycbcr_space_forward_planar(x_planar, *, rb=None):
    """Block-split each channel of a planar (B, 3, H, W) image.

    Returns (y, cb, cr), each (B, H*W/64, 8, 8) -- i.e.
    block_splitting(chroma_subsampling(x)) of the PyTorch module.
    """
    B, C, H, W = x_planar.shape
    assert C == 3 and H % K == 0 and W % K == 0
    hb, wb = H // K, W // K
    if rb is None:
        rb = _pick_rb(hb, W, x_planar.dtype.itemsize)
    assert hb % rb == 0

    # Free reshape: expose the 8-row block structure so the kernel can select
    # row-offset r with plain indexing.
    x5 = x_planar.reshape(B, 3, hb, K, W)

    out_sds = jax.ShapeDtypeStruct((B, hb, W * K), x_planar.dtype)
    out_spec = pl.BlockSpec((1, rb, W * K), lambda b, i: (b, i, 0))

    y, cb, cr = pl.pallas_call(
        functools.partial(_block_split_kernel, rb=rb, wb=wb),
        out_shape=(out_sds, out_sds, out_sds),
        grid=(B, hb // rb),
        in_specs=[pl.BlockSpec((1, 3, rb, K, W), lambda b, i: (b, 0, i, 0, 0))],
        out_specs=(out_spec, out_spec, out_spec),
        compiler_params=pltpu.CompilerParams(
            dimension_semantics=("parallel", "parallel")),
    )(x5)

    # Free (contiguous) reshape to the module's (B, H*W/64, 8, 8) block layout.
    blocks = (B, hb * wb, K, K)
    return y.reshape(blocks), cb.reshape(blocks), cr.reshape(blocks)


def ycbcr_space_forward(x, *, rb=None):
    """Forward of YCbCr_Space (chroma split + block splitting) for NHWC input.

    x: (B, H, W, 3).  Returns (y, cb, cr), each (B, H*W/64, 8, 8).
    """
    B, H, W, C = x.shape
    assert C == 3
    # Single layout pass NHWC -> planar (the remaining extra HBM pass).
    # TODO(synk): feed planar data from upstream, or fuse this pass into the
    # downstream 8x8 DCT matmul, to drop it entirely.
    x_planar = jnp.transpose(x, (0, 3, 1, 2))
    return ycbcr_space_forward_planar(x_planar, rb=rb)


def _ref_block_split(img):
    """Pure-JAX reference of block_splitting: (B, H, W) -> (B, H*W/64, 8, 8)."""
    B, H, W = img.shape
    r = img.reshape(B, H // K, K, W // K, K)
    t = jnp.transpose(r, (0, 1, 3, 2, 4))
    return t.reshape(B, -1, K, K)


if __name__ == "__main__":
    key = jax.random.PRNGKey(0)
    B, H, W = 2, 16, 16
    x = jax.random.uniform(key, (B, H, W, 3), dtype=jnp.float32)

    fwd = jax.jit(ycbcr_space_forward)
    y, cb, cr = fwd(x)
    jax.block_until_ready((y, cb, cr))

    assert y.shape == (B, H * W // 64, K, K)
    assert jnp.allclose(y, _ref_block_split(x[..., 0]))
    assert jnp.allclose(cb, _ref_block_split(x[..., 1]))
    assert jnp.allclose(cr, _ref_block_split(x[..., 2]))

    print("KERNEL_OK")
</pallas_src>

<mosaic_0001>
module attributes {stable_mosaic.version = 11 : i64} {
  func.func @_block_split_kernel(%arg0: i32, %arg1: i32, %arg2: memref<1x3x2x8x16xf32, #tpu.memory_space<vmem>>, %arg3: memref<1x2x128xf32, #tpu.memory_space<vmem>>, %arg4: memref<1x2x128xf32, #tpu.memory_space<vmem>>, %arg5: memref<1x2x128xf32, #tpu.memory_space<vmem>>) attributes {dimension_semantics = [#tpu.dimension_semantics<parallel>, #tpu.dimension_semantics<parallel>], iteration_bounds = array<i64: 2, 1>, scalar_prefetch = 0 : i64, scratch_operands = 0 : i64, tpu.core_type = #tpu.core_type<tc>, window_params = [{transform_indices = @transform_0, window_bounds = array<i64: 1, 3, 2, 8, 16>}, {transform_indices = @transform_1, window_bounds = array<i64: 1, 2, 128>}, {transform_indices = @transform_2, window_bounds = array<i64: 1, 2, 128>}, {transform_indices = @transform_3, window_bounds = array<i64: 1, 2, 128>}]} {
    %c0 = arith.constant 0 : index
    %c0_0 = arith.constant 0 : index
    %c0_1 = arith.constant 0 : index
    %c0_2 = arith.constant 0 : index
    %c0_3 = arith.constant 0 : index
    %0 = vector.load %arg2[%c0, %c0_0, %c0_1, %c0_2, %c0_3] : memref<1x3x2x8x16xf32, #tpu.memory_space<vmem>>, vector<1x1x2x1x16xf32>
    %1 = vector.shape_cast %0 : vector<1x1x2x1x16xf32> to vector<2x16xf32>
    %2 = vector.extract_strided_slice %1 {offsets = [0, 0], sizes = [2, 8], strides = [1, 1]} : vector<2x16xf32> to vector<2x8xf32>
    %c0_4 = arith.constant 0 : index
    %c0_5 = arith.constant 0 : index
    %c0_6 = arith.constant 0 : index
    %3 = vector.load %arg3[%c0_4, %c0_5, %c0_6] : memref<1x2x128xf32, #tpu.memory_space<vmem>>, vector<1x2x8xf32>
    %4 = vector.shape_cast %3 : vector<1x2x8xf32> to vector<2x8xf32>
    %5 = vector.shape_cast %2 : vector<2x8xf32> to vector<1x2x8xf32>
    tpu.vector_store %arg3[%c0_4, %c0_5, %c0_6], %5 {strides = array<i32>} : memref<1x2x128xf32, #tpu.memory_space<vmem>>, vector<1x2x8xf32>,
    %6 = vector.extract_strided_slice %1 {offsets = [0, 8], sizes = [2, 8], strides = [1, 1]} : vector<2x16xf32> to vector<2x8xf32>
    %c0_7 = arith.constant 0 : index
    %c0_8 = arith.constant 0 : index
    %c64 = arith.constant 64 : index
    %7 = vector.load %arg3[%c0_7, %c0_8, %c64] : memref<1x2x128xf32, #tpu.memory_space<vmem>>, vector<1x2x8xf32>
    %8 = vector.shape_cast %7 : vector<1x2x8xf32> to vector<2x8xf32>
    %9 = vector.shape_cast %6 : vector<2x8xf32> to vector<1x2x8xf32>
    tpu.vector_store %arg3[%c0_7, %c0_8, %c64], %9 {strides = array<i32>} : memref<1x2x128xf32, #tpu.memory_space<vmem>>, vector<1x2x8xf32>,
    %c0_9 = arith.constant 0 : index
    %c0_10 = arith.constant 0 : index
    %c0_11 = arith.constant 0 : index
    %c1 = arith.constant 1 : index
    %c0_12 = arith.constant 0 : index
    %10 = vector.load %arg2[%c0_9, %c0_10, %c0_11, %c1, %c0_12] : memref<1x3x2x8x16xf32, #tpu.memory_space<vmem>>, vector<1x1x2x1x16xf32>
    %11 = vector.shape_cast %10 : vector<1x1x2x1x16xf32> to vector<2x16xf32>
    %12 = vector.extract_strided_slice %11 {offsets = [0, 0], sizes = [2, 8], strides = [1, 1]} : vector<2x16xf32> to vector<2x8xf32>
    %c0_13 = arith.constant 0 : index
    %c0_14 = arith.constant 0 : index
    %c8 = arith.constant 8 : index
    %13 = vector.load %arg3[%c0_13, %c0_14, %c8] : memref<1x2x128xf32, #tpu.memory_space<vmem>>, vector<1x2x8xf32>
    %14 = vector.shape_cast %13 : vector<1x2x8xf32> to vector<2x8xf32>
    %15 = vector.shape_cast %12 : vector<2x8xf32> to vector<1x2x8xf32>
    tpu.vector_store %arg3[%c0_13, %c0_14, %c8], %15 {strides = array<i32>} : memref<1x2x128xf32, #tpu.memory_space<vmem>>, vector<1x2x8xf32>,
    %16 = vector.extract_strided_slice %11 {offsets = [0, 8], sizes = [2, 8], strides = [1, 1]} : vector<2x16xf32> to vector<2x8xf32>
    %c0_15 = arith.constant 0 : index
    %c0_16 = arith.constant 0 : index
    %c72 = arith.constant 72 : index
    %17 = vector.load %arg3[%c0_15, %c0_16, %c72] : memref<1x2x128xf32, #tpu.memory_space<vmem>>, vector<1x2x8xf32>
    %18 = vector.shape_cast %17 : vector<1x2x8xf32> to vector<2x8xf32>
    %19 = vector.shape_cast %16 : vector<2x8xf32> to vector<1x2x8xf32>
    tpu.vector_store %arg3[%c0_15, %c0_16, %c72], %19 {strides = array<i32>} : memref<1x2x128xf32, #tpu.memory_space<vmem>>, vector<1x2x8xf32>,
    %c0_17 = arith.constant 0 : index
    %c0_18 = arith.constant 0 : index
    %c0_19 = arith.constant 0 : index
    %c2 = arith.constant 2 : index
    %c0_20 = arith.constant 0 : index
    %20 = vector.load %arg2[%c0_17, %c0_18, %c0_19, %c2, %c0_20] : memref<1x3x2x8x16xf32, #tpu.memory_space<vmem>>, vector<1x1x2x1x16xf32>
    %21 = vector.shape_cast %20 : vector<1x1x2x1x16xf32> to vector<2x16xf32>
    %22 = vector.extract_strided_slice %21 {offsets = [0, 0], sizes = [2, 8], strides = [1, 1]} : vector<2x16xf32> to vector<2x8xf32>
    %c0_21 = arith.constant 0 : index
    %c0_22 = arith.constant 0 : index
    %c16 = arith.constant 16 : index
    %23 = vector.load %arg3[%c0_21, %c0_22, %c16] : memref<1x2x128xf32, #tpu.memory_space<vmem>>, vector<1x2x8xf32>
    %24 = vector.shape_cast %23 : vector<1x2x8xf32> to vector<2x8xf32>
    %25 = vector.shape_cast %22 : vector<2x8xf32> to vector<1x2x8xf32>
    tpu.vector_store %arg3[%c0_21, %c0_22, %c16], %25 {strides = array<i32>} : memref<1x2x128xf32, #tpu.memory_space<vmem>>, vector<1x2x8xf32>,
    %26 = vector.extract_strided_slice %21 {offsets = [0, 8], sizes = [2, 8], strides = [1, 1]} : vector<2x16xf32> to vector<2x8xf32>
    %c0_23 = arith.constant 0 : index
    %c0_24 = arith.constant 0 : index
    %c80 = arith.constant 80 : index
    %27 = vector.load %arg3[%c0_23, %c0_24, %c80] : memref<1x2x128xf32, #tpu.memory_space<vmem>>, vector<1x2x8xf32>
    %28 = vector.shape_cast %27 : vector<1x2x8xf32> to vector<2x8xf32>
    %29 = vector.shape_cast %26 : vector<2x8xf32> to vector<1x2x8xf32>
    tpu.vector_store %arg3[%c0_23, %c0_24, %c80], %29 {strides = array<i32>} : memref<1x2x128xf32, #tpu.memory_space<vmem>>, vector<1x2x8xf32>,
    %c0_25 = arith.constant 0 : index
    %c0_26 = arith.constant 0 : index
    %c0_27 = arith.constant 0 : index
    %c3 = arith.constant 3 : index
    %c0_28 = arith.constant 0 : index
    %30 = vector.load %arg2[%c0_25, %c0_26, %c0_27, %c3, %c0_28] : memref<1x3x2x8x16xf32, #tpu.memory_space<vmem>>, vector<1x1x2x1x16xf32>
    %31 = vector.shape_cast %30 : vector<1x1x2x1x16xf32> to vector<2x16xf32>
    %32 = vector.extract_strided_slice %31 {offsets = [0, 0], sizes = [2, 8], strides = [1, 1]} : vector<2x16xf32> to vector<2x8xf32>
    %c0_29 = arith.constant 0 : index
    %c0_30 = arith.constant 0 : index
    %c24 = arith.constant 24 : index
    %33 = vector.load %arg3[%c0_29, %c0_30, %c24] : memref<1x2x128xf32, #tpu.memory_space<vmem>>, vector<1x2x8xf32>
    %34 = vector.shape_cast %33 : vector<1x2x8xf32> to vector<2x8xf32>
    %35 = vector.shape_cast %32 : vector<2x8xf32> to vector<1x2x8xf32>
    tpu.vector_store %arg3[%c0_29, %c0_30, %c24], %35 {strides = array<i32>} : memref<1x2x128xf32, #tpu.memory_space<vmem>>, vector<1x2x8xf32>,
    %36 = vector.extract_strided_slice %31 {offsets = [0, 8], sizes = [2, 8], strides = [1, 1]} : vector<2x16xf32> to vector<2x8xf32>
    %c0_31 = arith.constant 0 : index
    %c0_32 = arith.constant 0 : index
    %c88 = arith.constant 88 : index
    %37 = vector.load %arg3[%c0_31, %c0_32, %c88] : memref<1x2x128xf32, #tpu.memory_space<vmem>>, vector<1x2x8xf32>
    %38 = vector.shape_cast %37 : vector<1x2x8xf32> to vector<2x8xf32>
    %39 = vector.shape_cast %36 : vector<2x8xf32> to vector<1x2x8xf32>
    tpu.vector_store %arg3[%c0_31, %c0_32, %c88], %39 {strides = array<i32>} : memref<1x2x128xf32, #tpu.memory_space<vmem>>, vector<1x2x8xf32>,
    %c0_33 = arith.constant 0 : index
    %c0_34 = arith.constant 0 : index
    %c0_35 = arith.constant 0 : index
    %c4 = arith.constant 4 : index
    %c0_36 = arith.constant 0 : index
    %40 = vector.load %arg2[%c0_33, %c0_34, %c0_35, %c4, %c0_36] : memref<1x3x2x8x16xf32, #tpu.memory_space<vmem>>, vector<1x1x2x1x16xf32>
    %41 = vector.shape_cast %40 : vector<1x1x2x1x16xf32> to vector<2x16xf32>
    %42 = vector.extract_strided_slice %41 {offsets = [0, 0], sizes = [2, 8], strides = [1, 1]} : vector<2x16xf32> to vector<2x8xf32>
    %c0_37 = arith.constant 0 : index
    %c0_38 = arith.constant 0 : index
    %c32 = arith.constant 32 : index
    %43 = vector.load %arg3[%c0_37, %c0_38, %c32] : memref<1x2x128xf32, #tpu.memory_space<vmem>>, vector<1x2x8xf32>
    %44 = vector.shape_cast %43 : vector<1x2x8xf32> to vector<2x8xf32>
    %45 = vector.shape_cast %42 : vector<2x8xf32> to vector<1x2x8xf32>
    tpu.vector_store %arg3[%c0_37, %c0_38, %c32], %45 {strides = array<i32>} : memref<1x2x128xf32, #tpu.memory_space<vmem>>, vector<1x2x8xf32>,
    %46 = vector.extract_strided_slice %41 {offsets = [0, 8], sizes = [2, 8], strides = [1, 1]} : vector<2x16xf32> to vector<2x8xf32>
    %c0_39 = arith.constant 0 : index
    %c0_40 = arith.constant 0 : index
    %c96 = arith.constant 96 : index
    %47 = vector.load %arg3[%c0_39, %c0_40, %c96] : memref<1x2x128xf32, #tpu.memory_space<vmem>>, vector<1x2x8xf32>
    %48 = vector.shape_cast %47 : vector<1x2x8xf32> to vector<2x8xf32>
    %49 = vector.shape_cast %46 : vector<2x8xf32> to vector<1x2x8xf32>
    tpu.vector_store %arg3[%c0_39, %c0_40, %c96], %49 {strides = array<i32>} : memref<1x2x128xf32, #tpu.memory_space<vmem>>, vector<1x2x8xf32>,
    %c0_41 = arith.constant 0 : index
    %c0_42 = arith.constant 0 : index
    %c0_43 = arith.constant 0 : index
    %c5 = arith.constant 5 : index
    %c0_44 = arith.constant 0 : index
    %50 = vector.load %arg2[%c0_41, %c0_42, %c0_43, %c5, %c0_44] : memref<1x3x2x8x16xf32, #tpu.memory_space<vmem>>, vector<1x1x2x1x16xf32>
    %51 = vector.shape_cast %50 : vector<1x1x2x1x16xf32> to vector<2x16xf32>
    %52 = vector.extract_strided_slice %51 {offsets = [0, 0], sizes = [2, 8], strides = [1, 1]} : vector<2x16xf32> to vector<2x8xf32>
    %c0_45 = arith.constant 0 : index
    %c0_46 = arith.constant 0 : index
    %c40 = arith.constant 40 : index
    %53 = vector.load %arg3[%c0_45, %c0_46, %c40] : memref<1x2x128xf32, #tpu.memory_space<vmem>>, vector<1x2x8xf32>
    %54 = vector.shape_cast %53 : vector<1x2x8xf32> to vector<2x8xf32>
    %55 = vector.shape_cast %52 : vector<2x8xf32> to vector<1x2x8xf32>
    tpu.vector_store %arg3[%c0_45, %c0_46, %c40], %55 {strides = array<i32>} : memref<1x2x128xf32, #tpu.memory_space<vmem>>, vector<1x2x8xf32>,
    %56 = vector.extract_strided_slice %51 {offsets = [0, 8], sizes = [2, 8], strides = [1, 1]} : vector<2x16xf32> to vector<2x8xf32>
    %c0_47 = arith.constant 0 : index
    %c0_48 = arith.constant 0 : index
    %c104 = arith.constant 104 : index
    %57 = vector.load %arg3[%c0_47, %c0_48, %c104] : memref<1x2x128xf32, #tpu.memory_space<vmem>>, vector<1x2x8xf32>
    %58 = vector.shape_cast %57 : vector<1x2x8xf32> to vector<2x8xf32>
    %59 = vector.shape_cast %56 : vector<2x8xf32> to vector<1x2x8xf32>
    tpu.vector_store %arg3[%c0_47, %c0_48, %c104], %59 {strides = array<i32>} : memref<1x2x128xf32, #tpu.memory_space<vmem>>, vector<1x2x8xf32>,
    %c0_49 = arith.constant 0 : index
    %c0_50 = arith.constant 0 : index
    %c0_51 = arith.constant 0 : index
    %c6 = arith.constant 6 : index
    %c0_52 = arith.constant 0 : index
    %60 = vector.load %arg2[%c0_49, %c0_50, %c0_51, %c6, %c0_52] : memref<1x3x2x8x16xf32, #tpu.memory_space<vmem>>, vector<1x1x2x1x16xf32>
    %61 = vector.shape_cast %60 : vector<1x1x2x1x16xf32> to vector<2x16xf32>
    %62 = vector.extract_strided_slice %61 {offsets = [0, 0], sizes = [2, 8], strides = [1, 1]} : vector<2x16xf32> to vector<2x8xf32>
    %c0_53 = arith.constant 0 : index
    %c0_54 = arith.constant 0 : index
    %c48 = arith.constant 48 : index
    %63 = vector.load %arg3[%c0_53, %c0_54, %c48] : memref<1x2x128xf32, #tpu.memory_space<vmem>>, vector<1x2x8xf32>
    %64 = vector.shape_cast %63 : vector<1x2x8xf32> to vector<2x8xf32>
    %65 = vector.shape_cast %62 : vector<2x8xf32> to vector<1x2x8xf32>
    tpu.vector_store %arg3[%c0_53, %c0_54, %c48], %65 {strides = array<i32>} : memref<1x2x128xf32, #tpu.memory_space<vmem>>, vector<1x2x8xf32>,
    %66 = vector.extract_strided_slice %61 {offsets = [0, 8], sizes = [2, 8], strides = [1, 1]} : vector<2x16xf32> to vector<2x8xf32>
    %c0_55 = arith.constant 0 : index
    %c0_56 = arith.constant 0 : index
    %c112 = arith.constant 112 : index
    %67 = vector.load %arg3[%c0_55, %c0_56, %c112] : memref<1x2x128xf32, #tpu.memory_space<vmem>>, vector<1x2x8xf32>
    %68 = vector.shape_cast %67 : vector<1x2x8xf32> to vector<2x8xf32>
    %69 = vector.shape_cast %66 : vector<2x8xf32> to vector<1x2x8xf32>
    tpu.vector_store %arg3[%c0_55, %c0_56, %c112], %69 {strides = array<i32>} : memref<1x2x128xf32, #tpu.memory_space<vmem>>, vector<1x2x8xf32>,
    %c0_57 = arith.constant 0 : index
    %c0_58 = arith.constant 0 : index
    %c0_59 = arith.constant 0 : index
    %c7 = arith.constant 7 : index
    %c0_60 = arith.constant 0 : index
    %70 = vector.load %arg2[%c0_57, %c0_58, %c0_59, %c7, %c0_60] : memref<1x3x2x8x16xf32, #tpu.memory_space<vmem>>, vector<1x1x2x1x16xf32>
    %71 = vector.shape_cast %70 : vector<1x1x2x1x16xf32> to vector<2x16xf32>
    %72 = vector.extract_strided_slice %71 {offsets = [0, 0], sizes = [2, 8], strides = [1, 1]} : vector<2x16xf32> to vector<2x8xf32>
    %c0_61 = arith.constant 0 : index
    %c0_62 = arith.constant 0 : index
    %c56 = arith.constant 56 : index
    %73 = vector.load %arg3[%c0_61, %c0_62, %c56] : memref<1x2x128xf32, #tpu.memory_space<vmem>>, vector<1x2x8xf32>
    %74 = vector.shape_cast %73 : vector<1x2x8xf32> to vector<2x8xf32>
    %75 = vector.shape_cast %72 : vector<2x8xf32> to vector<1x2x8xf32>
    tpu.vector_store %arg3[%c0_61, %c0_62, %c56], %75 {strides = array<i32>} : memref<1x2x128xf32, #tpu.memory_space<vmem>>, vector<1x2x8xf32>,
    %76 = vector.extract_strided_slice %71 {offsets = [0, 8], sizes = [2, 8], strides = [1, 1]} : vector<2x16xf32> to vector<2x8xf32>
    %c0_63 = arith.constant 0 : index
    %c0_64 = arith.constant 0 : index
    %c120 = arith.constant 120 : index
    %77 = vector.load %arg3[%c0_63, %c0_64, %c120] : memref<1x2x128xf32, #tpu.memory_space<vmem>>, vector<1x2x8xf32>
    %78 = vector.shape_cast %77 : vector<1x2x8xf32> to vector<2x8xf32>
    %79 = vector.shape_cast %76 : vector<2x8xf32> to vector<1x2x8xf32>
    tpu.vector_store %arg3[%c0_63, %c0_64, %c120], %79 {strides = array<i32>} : memref<1x2x128xf32, #tpu.memory_space<vmem>>, vector<1x2x8xf32>,
    %c0_65 = arith.constant 0 : index
    %c1_66 = arith.constant 1 : index
    %c0_67 = arith.constant 0 : index
    %c0_68 = arith.constant 0 : index
    %c0_69 = arith.constant 0 : index
    %80 = vector.load %arg2[%c0_65, %c1_66, %c0_67, %c0_68, %c0_69] : memref<1x3x2x8x16xf32, #tpu.memory_space<vmem>>, vector<1x1x2x1x16xf32>
    %81 = vector.shape_cast %80 : vector<1x1x2x1x16xf32> to vector<2x16xf32>
    %82 = vector.extract_strided_slice %81 {offsets = [0, 0], sizes = [2, 8], strides = [1, 1]} : vector<2x16xf32> to vector<2x8xf32>
    %c0_70 = arith.constant 0 : index
    %c0_71 = arith.constant 0 : index
    %c0_72 = arith.constant 0 : index
    %83 = vector.load %arg4[%c0_70, %c0_71, %c0_72] : memref<1x2x128xf32, #tpu.memory_space<vmem>>, vector<1x2x8xf32>
    %84 = vector.shape_cast %83 : vector<1x2x8xf32> to vector<2x8xf32>
    %85 = vector.shape_cast %82 : vector<2x8xf32> to vector<1x2x8xf32>
    tpu.vector_store %arg4[%c0_70, %c0_71, %c0_72], %85 {strides = array<i32>} : memref<1x2x128xf32, #tpu.memory_space<vmem>>, vector<1x2x8xf32>,
    %86 = vector.extract_strided_slice %81 {offsets = [0, 8], sizes = [2, 8], strides = [1, 1]} : vector<2x16xf32> to vector<2x8xf32>
    %c0_73 = arith.constant 0 : index
    %c0_74 = arith.constant 0 : index
    %c64_75 = arith.constant 64 : index
    %87 = vector.load %arg4[%c0_73, %c0_74, %c64_75] : memref<1x2x128xf32, #tpu.memory_space<vmem>>, vector<1x2x8xf32>
    %88 = vector.shape_cast %87 : vector<1x2x8xf32> to vector<2x8xf32>
    %89 = vector.shape_cast %86 : vector<2x8xf32> to vector<1x2x8xf32>
    tpu.vector_store %arg4[%c0_73, %c0_74, %c64_75], %89 {strides = array<i32>} : memref<1x2x128xf32, #tpu.memory_space<vmem>>, vector<1x2x8xf32>,
    %c0_76 = arith.constant 0 : index
    %c1_77 = arith.constant 1 : index
    %c0_78 = arith.constant 0 : index
    %c1_79 = arith.constant 1 : index
    %c0_80 = arith.constant 0 : index
    %90 = vector.load %arg2[%c0_76, %c1_77, %c0_78, %c1_79, %c0_80] : memref<1x3x2x8x16xf32, #tpu.memory_space<vmem>>, vector<1x1x2x1x16xf32>
    %91 = vector.shape_cast %90 : vector<1x1x2x1x16xf32> to vector<2x16xf32>
    %92 = vector.extract_strided_slice %91 {offsets = [0, 0], sizes = [2, 8], strides = [1, 1]} : vector<2x16xf32> to vector<2x8xf32>
    %c0_81 = arith.constant 0 : index
    %c0_82 = arith.constant 0 : index
    %c8_83 = arith.constant 8 : index
    %93 = vector.load %arg4[%c0_81, %c0_82, %c8_83] : memref<1x2x128xf32, #tpu.memory_space<vmem>>, vector<1x2x8xf32>
    %94 = vector.shape_cast %93 : vector<1x2x8xf32> to vector<2x8xf32>
    %95 = vector.shape_cast %92 : vector<2x8xf32> to vector<1x2x8xf32>
    tpu.vector_store %arg4[%c0_81, %c0_82, %c8_83], %95 {strides = array<i32>} : memref<1x2x128xf32, #tpu.memory_space<vmem>>, vector<1x2x8xf32>,
    %96 = vector.extract_strided_slice %91 {offsets = [0, 8], sizes = [2, 8], strides = [1, 1]} : vector<2x16xf32> to vector<2x8xf32>
    %c0_84 = arith.constant 0 : index
    %c0_85 = arith.constant 0 : index
    %c72_86 = arith.constant 72 : index
    %97 = vector.load %arg4[%c0_84, %c0_85, %c72_86] : memref<1x2x128xf32, #tpu.memory_space<vmem>>, vector<1x2x8xf32>
    %98 = vector.shape_cast %97 : vector<1x2x8xf32> to vector<2x8xf32>
    %99 = vector.shape_cast %96 : vector<2x8xf32> to vector<1x2x8xf32>
    tpu.vector_store %arg4[%c0_84, %c0_85, %c72_86], %99 {strides = array<i32>} : memref<1x2x128xf32, #tpu.memory_space<vmem>>, vector<1x2x8xf32>,
    %c0_87 = arith.constant 0 : index
    %c1_88 = arith.constant 1 : index
    %c0_89 = arith.constant 0 : index
    %c2_90 = arith.constant 2 : index
    %c0_91 = arith.constant 0 : index
    %100 = vector.load %arg2[%c0_87, %c1_88, %c0_89, %c2_90, %c0_91] : memref<1x3x2x8x16xf32, #tpu.memory_space<vmem>>, vector<1x1x2x1x16xf32>
    %101 = vector.shape_cast %100 : vector<1x1x2x1x16xf32> to vector<2x16xf32>
    %102 = vector.extract_strided_slice %101 {offsets = [0, 0], sizes = [2, 8], strides = [1, 1]} : vector<2x16xf32> to vector<2x8xf32>
    %c0_92 = arith.constant 0 : index
    %c0_93 = arith.constant 0 : index
    %c16_94 = arith.constant 16 : index
    %103 = vector.load %arg4[%c0_92, %c0_93, %c16_94] : memref<1x2x128xf32, #tpu.memory_space<vmem>>, vector<1x2x8xf32>
    %104 = vector.shape_cast %103 : vector<1x2x8xf32> to vector<2x8xf32>
    %105 = vector.shape_cast %102 : vector<2x8xf32> to vector<1x2x8xf32>
    tpu.vector_store %arg4[%c0_92, %c0_93, %c16_94], %105 {strides = array<i32>} : memref<1x2x128xf32, #tpu.memory_space<vmem>>, vector<1x2x8xf32>,
    %106 = vector.extract_strided_slice %101 {offsets = [0, 8], sizes = [2, 8], strides = [1, 1]} : vector<2x16xf32> to vector<2x8xf32>
    %c0_95 = arith.constant 0 : index
    %c0_96 = arith.constant 0 : index
    %c80_97 = arith.constant 80 : index
    %107 = vector.load %arg4[%c0_95, %c0_96, %c80_97] : memref<1x2x128xf32, #tpu.memory_space<vmem>>, vector<1x2x8xf32>
    %108 = vector.shape_cast %107 : vector<1x2x8xf32> to vector<2x8xf32>
    %109 = vector.shape_cast %106 : vector<2x8xf32> to vector<1x2x8xf32>
    tpu.vector_store %arg4[%c0_95, %c0_96, %c80_97], %109 {strides = array<i32>} : memref<1x2x128xf32, #tpu.memory_space<vmem>>, vector<1x2x8xf32>,
    %c0_98 = arith.constant 0 : index
    %c1_99 = arith.constant 1 : index
    %c0_100 = arith.constant 0 : index
    %c3_101 = arith.constant 3 : index
    %c0_102 = arith.constant 0 : index
    %110 = vector.load %arg2[%c0_98, %c1_99, %c0_100, %c3_101, %c0_102] : memref<1x3x2x8x16xf32, #tpu.memory_space<vmem>>, vector<1x1x2x1x16xf32>
    %111 = vector.shape_cast %110 : vector<1x1x2x1x16xf32> to vector<2x16xf32>
    %112 = vector.extract_strided_slice %111 {offsets = [0, 0], sizes = [2, 8], strides = [1, 1]} : vector<2x16xf32> to vector<2x8xf32>
    %c0_103 = arith.constant 0 : index
    %c0_104 = arith.constant 0 : index
    %c24_105 = arith.constant 24 : index
    %113 = vector.load %arg4[%c0_103, %c0_104, %c24_105] : memref<1x2x128xf32, #tpu.memory_space<vmem>>, vector<1x2x8xf32>
    %114 = vector.shape_cast %113 : vector<1x2x8xf32> to vector<2x8xf32>
    %115 = vector.shape_cast %112 : vector<2x8xf32> to vector<1x2x8xf32>
    tpu.vector_store %arg4[%c0_103, %c0_104, %c24_105], %115 {strides = array<i32>} : memref<1x2x128xf32, #tpu.memory_space<vmem>>, vector<1x2x8xf32>,
    %116 = vector.extract_strided_slice %111 {offsets = [0, 8], sizes = [2, 8], strides = [1, 1]} : vector<2x16xf32> to vector<2x8xf32>
    %c0_106 = arith.constant 0 : index
    %c0_107 = arith.constant 0 : index
    %c88_108 = arith.constant 88 : index
    %117 = vector.load %arg4[%c0_106, %c0_107, %c88_108] : memref<1x2x128xf32, #tpu.memory_space<vmem>>, vector<1x2x8xf32>
    %118 = vector.shape_cast %117 : vector<1x2x8xf32> to vector<2x8xf32>
    %119 = vector.shape_cast %116 : vector<2x8xf32> to vector<1x2x8xf32>
    tpu.vector_store %arg4[%c0_106, %c0_107, %c88_108], %119 {strides = array<i32>} : memref<1x2x128xf32, #tpu.memory_space<vmem>>, vector<1x2x8xf32>,
    %c0_109 = arith.constant 0 : index
    %c1_110 = arith.constant 1 : index
    %c0_111 = arith.constant 0 : index
    %c4_112 = arith.constant 4 : index
    %c0_113 = arith.constant 0 : index
    %120 = vector.load %arg2[%c0_109, %c1_110, %c0_111, %c4_112, %c0_113] : memref<1x3x2x8x16xf32, #tpu.memory_space<vmem>>, vector<1x1x2x1x16xf32>
    %121 = vector.shape_cast %120 : vector<1x1x2x1x16xf32> to vector<2x16xf32>
    %122 = vector.extract_strided_slice %121 {offsets = [0, 0], sizes = [2, 8], strides = [1, 1]} : vector<2x16xf32> to vector<2x8xf32>
    %c0_114 = arith.constant 0 : index
    %c0_115 = arith.constant 0 : index
    %c32_116 = arith.constant 32 : index
    %123 = vector.load %arg4[%c0_114, %c0_115, %c32_116] : memref<1x2x128xf32, #tpu.memory_space<vmem>>, vector<1x2x8xf32>
    %124 = vector.shape_cast %123 : vector<1x2x8xf32> to vector<2x8xf32>
    %125 = vector.shape_cast %122 : vector<2x8xf32> to vector<1x2x8xf32>
    tpu.vector_store %arg4[%c0_114, %c0_115, %c32_116], %125 {strides = array<i32>} : memref<1x2x128xf32, #tpu.memory_space<vmem>>, vector<1x2x8xf32>,
    %126 = vector.extract_strided_slice %121 {offsets = [0, 8], sizes = [2, 8], strides = [1, 1]} : vector<2x16xf32> to vector<2x8xf32>
    %c0_117 = arith.constant 0 : index
    %c0_118 = arith.constant 0 : index
    %c96_119 = arith.constant 96 : index
    %127 = vector.load %arg4[%c0_117, %c0_118, %c96_119] : memref<1x2x128xf32, #tpu.memory_space<vmem>>, vector<1x2x8xf32>
    %128 = vector.shape_cast %127 : vector<1x2x8xf32> to vector<2x8xf32>
    %129 = vector.shape_cast %126 : vector<2x8xf32> to vector<1x2x8xf32>
    tpu.vector_store %arg4[%c0_117, %c0_118, %c96_119], %129 {strides = array<i32>} : memref<1x2x128xf32, #tpu.memory_space<vmem>>, vector<1x2x8xf32>,
    %c0_120 = arith.constant 0 : index
    %c1_121 = arith.constant 1 : index
    %c0_122 = arith.constant 0 : index
    %c5_123 = arith.constant 5 : index
    %c0_124 = arith.constant 0 : index
    %130 = vector.load %arg2[%c0_120, %c1_121, %c0_122, %c5_123, %c0_124] : memref<1x3x2x8x16xf32, #tpu.memory_space<vmem>>, vector<1x1x2x1x16xf32>
    %131 = vector.shape_cast %130 : vector<1x1x2x1x16xf32> to vector<2x16xf32>
    %132 = vector.extract_strided_slice %131 {offsets = [0, 0], sizes = [2, 8], strides = [1, 1]} : vector<2x16xf32> to vector<2x8xf32>
    %c0_125 = arith.constant 0 : index
    %c0_126 = arith.constant 0 : index
    %c40_127 = arith.constant 40 : index
    %133 = vector.load %arg4[%c0_125, %c0_126, %c40_127] : memref<1x2x128xf32, #tpu.memory_space<vmem>>, vector<1x2x8xf32>
    %134 = vector.shape_cast %133 : vector<1x2x8xf32> to vector<2x8xf32>
    %135 = vector.shape_cast %132 : vector<2x8xf32> to vector<1x2x8xf32>
    tpu.vector_store %arg4[%c0_125, %c0_126, %c40_127], %135 {strides = array<i32>} : memref<1x2x128xf32, #tpu.memory_space<vmem>>, vector<1x2x8xf32>,
    %136 = vector.extract_strided_slice %131 {offsets = [0, 8], sizes = [2, 8], strides = [1, 1]} : vector<2x16xf32> to vector<2x8xf32>
    %c0_128 = arith.constant 0 : index
    %c0_129 = arith.constant 0 : index
    %c104_130 = arith.constant 104 : index
    %137 = vector.load %arg4[%c0_128, %c0_129, %c104_130] : memref<1x2x128xf32, #tpu.memory_space<vmem>>, vector<1x2x8xf32>
    %138 = vector.shape_cast %137 : vector<1x2x8xf32> to vector<2x8xf32>
    %139 = vector.shape_cast %136 : vector<2x8xf32> to vector<1x2x8xf32>
    tpu.vector_store %arg4[%c0_128, %c0_129, %c104_130], %139 {strides = array<i32>} : memref<1x2x128xf32, #tpu.memory_space<vmem>>, vector<1x2x8xf32>,
    %c0_131 = arith.constant 0 : index
    %c1_132 = arith.constant 1 : index
    %c0_133 = arith.constant 0 : index
    %c6_134 = arith.constant 6 : index
    %c0_135 = arith.constant 0 : index
    %140 = vector.load %arg2[%c0_131, %c1_132, %c0_133, %c6_134, %c0_135] : memref<1x3x2x8x16xf32, #tpu.memory_space<vmem>>, vector<1x1x2x1x16xf32>
    %141 = vector.shape_cast %140 : vector<1x1x2x1x16xf32> to vector<2x16xf32>
    %142 = vector.extract_strided_slice %141 {offsets = [0, 0], sizes = [2, 8], strides = [1, 1]} : vector<2x16xf32> to vector<2x8xf32>
    %c0_136 = arith.constant 0 : index
    %c0_137 = arith.constant 0 : index
    %c48_138 = arith.constant 48 : index
    %143 = vector.load %arg4[%c0_136, %c0_137, %c48_138] : memref<1x2x128xf32, #tpu.memory_space<vmem>>, vector<1x2x8xf32>
    %144 = vector.shape_cast %143 : vector<1x2x8xf32> to vector<2x8xf32>
    %145 = vector.shape_cast %142 : vector<2x8xf32> to vector<1x2x8xf32>
    tpu.vector_store %arg4[%c0_136, %c0_137, %c48_138], %145 {strides = array<i32>} : memref<1x2x128xf32, #tpu.memory_space<vmem>>, vector<1x2x8xf32>,
    %146 = vector.extract_strided_slice %141 {offsets = [0, 8], sizes = [2, 8], strides = [1, 1]} : vector<2x16xf32> to vector<2x8xf32>
    %c0_139 = arith.constant 0 : index
    %c0_140 = arith.constant 0 : index
    %c112_141 = arith.constant 112 : index
    %147 = vector.load %arg4[%c0_139, %c0_140, %c112_141] : memref<1x2x128xf32, #tpu.memory_space<vmem>>, vector<1x2x8xf32>
    %148 = vector.shape_cast %147 : vector<1x2x8xf32> to vector<2x8xf32>
    %149 = vector.shape_cast %146 : vector<2x8xf32> to vector<1x2x8xf32>
    tpu.vector_store %arg4[%c0_139, %c0_140, %c112_141], %149 {strides = array<i32>} : memref<1x2x128xf32, #tpu.memory_space<vmem>>, vector<1x2x8xf32>,
    %c0_142 = arith.constant 0 : index
    %c1_143 = arith.constant 1 : index
    %c0_144 = arith.constant 0 : index
    %c7_145 = arith.constant 7 : index
    %c0_146 = arith.constant 0 : index
    %150 = vector.load %arg2[%c0_142, %c1_143, %c0_144, %c7_145, %c0_146] : memref<1x3x2x8x16xf32, #tpu.memory_space<vmem>>, vector<1x1x2x1x16xf32>
    %151 = vector.shape_cast %150 : vector<1x1x2x1x16xf32> to vector<2x16xf32>
    %152 = vector.extract_strided_slice %151 {offsets = [0, 0], sizes = [2, 8], strides = [1, 1]} : vector<2x16xf32> to vector<2x8xf32>
    %c0_147 = arith.constant 0 : index
    %c0_148 = arith.constant 0 : index
    %c56_149 = arith.constant 56 : index
    %153 = vector.load %arg4[%c0_147, %c0_148, %c56_149] : memref<1x2x128xf32, #tpu.memory_space<vmem>>, vector<1x2x8xf32>
    %154 = vector.shape_cast %153 : vector<1x2x8xf32> to vector<2x8xf32>
    %155 = vector.shape_cast %152 : vector<2x8xf32> to vector<1x2x8xf32>
    tpu.vector_store %arg4[%c0_147, %c0_148, %c56_149], %155 {strides = array<i32>} : memref<1x2x128xf32, #tpu.memory_space<vmem>>, vector<1x2x8xf32>,
    %156 = vector.extract_strided_slice %151 {offsets = [0, 8], sizes = [2, 8], strides = [1, 1]} : vector<2x16xf32> to vector<2x8xf32>
    %c0_150 = arith.constant 0 : index
    %c0_151 = arith.constant 0 : index
    %c120_152 = arith.constant 120 : index
    %157 = vector.load %arg4[%c0_150, %c0_151, %c120_152] : memref<1x2x128xf32, #tpu.memory_space<vmem>>, vector<1x2x8xf32>
    %158 = vector.shape_cast %157 : vector<1x2x8xf32> to vector<2x8xf32>
    %159 = vector.shape_cast %156 : vector<2x8xf32> to vector<1x2x8xf32>
    tpu.vector_store %arg4[%c0_150, %c0_151, %c120_152], %159 {strides = array<i32>} : memref<1x2x128xf32, #tpu.memory_space<vmem>>, vector<1x2x8xf32>,
    %c0_153 = arith.constant 0 : index
    %c2_154 = arith.constant 2 : index
    %c0_155 = arith.constant 0 : index
    %c0_156 = arith.constant 0 : index
    %c0_157 = arith.constant 0 : index
    %160 = vector.load %arg2[%c0_153, %c2_154, %c0_155, %c0_156, %c0_157] : memref<1x3x2x8x16xf32, #tpu.memory_space<vmem>>, vector<1x1x2x1x16xf32>
    %161 = vector.shape_cast %160 : vector<1x1x2x1x16xf32> to vector<2x16xf32>
    %162 = vector.extract_strided_slice %161 {offsets = [0, 0], sizes = [2, 8], strides = [1, 1]} : vector<2x16xf32> to vector<2x8xf32>
    %c0_158 = arith.constant 0 : index
    %c0_159 = arith.constant 0 : index
    %c0_160 = arith.constant 0 : index
    %163 = vector.load %arg5[%c0_158, %c0_159, %c0_160] : memref<1x2x128xf32, #tpu.memory_space<vmem>>, vector<1x2x8xf32>
    %164 = vector.shape_cast %163 : vector<1x2x8xf32> to vector<2x8xf32>
    %165 = vector.shape_cast %162 : vector<2x8xf32> to vector<1x2x8xf32>
    tpu.vector_store %arg5[%c0_158, %c0_159, %c0_160], %165 {strides = array<i32>} : memref<1x2x128xf32, #tpu.memory_space<vmem>>, vector<1x2x8xf32>,
    %166 = vector.extract_strided_slice %161 {offsets = [0, 8], sizes = [2, 8], strides = [1, 1]} : vector<2x16xf32> to vector<2x8xf32>
    %c0_161 = arith.constant 0 : index
    %c0_162 = arith.constant 0 : index
    %c64_163 = arith.constant 64 : index
    %167 = vector.load %arg5[%c0_161, %c0_162, %c64_163] : memref<1x2x128xf32, #tpu.memory_space<vmem>>, vector<1x2x8xf32>
    %168 = vector.shape_cast %167 : vector<1x2x8xf32> to vector<2x8xf32>
    %169 = vector.shape_cast %166 : vector<2x8xf32> to vector<1x2x8xf32>
    tpu.vector_store %arg5[%c0_161, %c0_162, %c64_163], %169 {strides = array<i32>} : memref<1x2x128xf32, #tpu.memory_space<vmem>>, vector<1x2x8xf32>,
    %c0_164 = arith.constant 0 : index
    %c2_165 = arith.constant 2 : index
    %c0_166 = arith.constant 0 : index
    %c1_167 = arith.constant 1 : index
    %c0_168 = arith.constant 0 : index
    %170 = vector.load %arg2[%c0_164, %c2_165, %c0_166, %c1_167, %c0_168] : memref<1x3x2x8x16xf32, #tpu.memory_space<vmem>>, vector<1x1x2x1x16xf32>
    %171 = vector.shape_cast %170 : vector<1x1x2x1x16xf32> to vector<2x16xf32>
    %172 = vector.extract_strided_slice %171 {offsets = [0, 0], sizes = [2, 8], strides = [1, 1]} : vector<2x16xf32> to vector<2x8xf32>
    %c0_169 = arith.constant 0 : index
    %c0_170 = arith.constant 0 : index
    %c8_171 = arith.constant 8 : index
    %173 = vector.load %arg5[%c0_169, %c0_170, %c8_171] : memref<1x2x128xf32, #tpu.memory_space<vmem>>, vector<1x2x8xf32>
    %174 = vector.shape_cast %173 : vector<1x2x8xf32> to vector<2x8xf32>
    %175 = vector.shape_cast %172 : vector<2x8xf32> to vector<1x2x8xf32>
    tpu.vector_store %arg5[%c0_169, %c0_170, %c8_171], %175 {strides = array<i32>} : memref<1x2x128xf32, #tpu.memory_space<vmem>>, vector<1x2x8xf32>,
    %176 = vector.extract_strided_slice %171 {offsets = [0, 8], sizes = [2, 8], strides = [1, 1]} : vector<2x16xf32> to vector<2x8xf32>
    %c0_172 = arith.constant 0 : index
    %c0_173 = arith.constant 0 : index
    %c72_174 = arith.constant 72 : index
    %177 = vector.load %arg5[%c0_172, %c0_173, %c72_174] : memref<1x2x128xf32, #tpu.memory_space<vmem>>, vector<1x2x8xf32>
    %178 = vector.shape_cast %177 : vector<1x2x8xf32> to vector<2x8xf32>
    %179 = vector.shape_cast %176 : vector<2x8xf32> to vector<1x2x8xf32>
    tpu.vector_store %arg5[%c0_172, %c0_173, %c72_174], %179 {strides = array<i32>} : memref<1x2x128xf32, #tpu.memory_space<vmem>>, vector<1x2x8xf32>,
    %c0_175 = arith.constant 0 : index
    %c2_176 = arith.constant 2 : index
    %c0_177 = arith.constant 0 : index
    %c2_178 = arith.constant 2 : index
    %c0_179 = arith.constant 0 : index
    %180 = vector.load %arg2[%c0_175, %c2_176, %c0_177, %c2_178, %c0_179] : memref<1x3x2x8x16xf32, #tpu.memory_space<vmem>>, vector<1x1x2x1x16xf32>
    %181 = vector.shape_cast %180 : vector<1x1x2x1x16xf32> to vector<2x16xf32>
    %182 = vector.extract_strided_slice %181 {offsets = [0, 0], sizes = [2, 8], strides = [1, 1]} : vector<2x16xf32> to vector<2x8xf32>
    %c0_180 = arith.constant 0 : index
    %c0_181 = arith.constant 0 : index
    %c16_182 = arith.constant 16 : index
    %183 = vector.load %arg5[%c0_180, %c0_181, %c16_182] : memref<1x2x128xf32, #tpu.memory_space<vmem>>, vector<1x2x8xf32>
    %184 = vector.shape_cast %183 : vector<1x2x8xf32> to vector<2x8xf32>
    %185 = vector.shape_cast %182 : vector<2x8xf32> to vector<1x2x8xf32>
    tpu.vector_store %arg5[%c0_180, %c0_181, %c16_182], %185 {strides = array<i32>} : memref<1x2x128xf32, #tpu.memory_space<vmem>>, vector<1x2x8xf32>,
    %186 = vector.extract_strided_slice %181 {offsets = [0, 8], sizes = [2, 8], strides = [1, 1]} : vector<2x16xf32> to vector<2x8xf32>
    %c0_183 = arith.constant 0 : index
    %c0_184 = arith.constant 0 : index
    %c80_185 = arith.constant 80 : index
    %187 = vector.load %arg5[%c0_183, %c0_184, %c80_185] : memref<1x2x128xf32, #tpu.memory_space<vmem>>, vector<1x2x8xf32>
    %188 = vector.shape_cast %187 : vector<1x2x8xf32> to vector<2x8xf32>
    %189 = vector.shape_cast %186 : vector<2x8xf32> to vector<1x2x8xf32>
    tpu.vector_store %arg5[%c0_183, %c0_184, %c80_185], %189 {strides = array<i32>} : memref<1x2x128xf32, #tpu.memory_space<vmem>>, vector<1x2x8xf32>,
    %c0_186 = arith.constant 0 : index
    %c2_187 = arith.constant 2 : index
    %c0_188 = arith.constant 0 : index
    %c3_189 = arith.constant 3 : index
    %c0_190 = arith.constant 0 : index
    %190 = vector.load %arg2[%c0_186, %c2_187, %c0_188, %c3_189, %c0_190] : memref<1x3x2x8x16xf32, #tpu.memory_space<vmem>>, vector<1x1x2x1x16xf32>
    %191 = vector.shape_cast %190 : vector<1x1x2x1x16xf32> to vector<2x16xf32>
    %192 = vector.extract_strided_slice %191 {offsets = [0, 0], sizes = [2, 8], strides = [1, 1]} : vector<2x16xf32> to vector<2x8xf32>
    %c0_191 = arith.constant 0 : index
    %c0_192 = arith.constant 0 : index
    %c24_193 = arith.constant 24 : index
    %193 = vector.load %arg5[%c0_191, %c0_192, %c24_193] : memref<1x2x128xf32, #tpu.memory_space<vmem>>, vector<1x2x8xf32>
    %194 = vector.shape_cast %193 : vector<1x2x8xf32> to vector<2x8xf32>
    %195 = vector.shape_cast %192 : vector<2x8xf32> to vector<1x2x8xf32>
    tpu.vector_store %arg5[%c0_191, %c0_192, %c24_193], %195 {strides = array<i32>} : memref<1x2x128xf32, #tpu.memory_space<vmem>>, vector<1x2x8xf32>,
    %196 = vector.extract_strided_slice %191 {offsets = [0, 8], sizes = [2, 8], strides = [1, 1]} : vector<2x16xf32> to vector<2x8xf32>
    %c0_194 = arith.constant 0 : index
    %c0_195 = arith.constant 0 : index
    %c88_196 = arith.constant 88 : index
    %197 = vector.load %arg5[%c0_194, %c0_195, %c88_196] : memref<1x2x128xf32, #tpu.memory_space<vmem>>, vector<1x2x8xf32>
    %198 = vector.shape_cast %197 : vector<1x2x8xf32> to vector<2x8xf32>
    %199 = vector.shape_cast %196 : vector<2x8xf32> to vector<1x2x8xf32>
    tpu.vector_store %arg5[%c0_194, %c0_195, %c88_196], %199 {strides = array<i32>} : memref<1x2x128xf32, #tpu.memory_space<vmem>>, vector<1x2x8xf32>,
    %c0_197 = arith.constant 0 : index
    %c2_198 = arith.constant 2 : index
    %c0_199 = arith.constant 0 : index
    %c4_200 = arith.constant 4 : index
    %c0_201 = arith.constant 0 : index
    %200 = vector.load %arg2[%c0_197, %c2_198, %c0_199, %c4_200, %c0_201] : memref<1x3x2x8x16xf32, #tpu.memory_space<vmem>>, vector<1x1x2x1x16xf32>
    %201 = vector.shape_cast %200 : vector<1x1x2x1x16xf32> to vector<2x16xf32>
    %202 = vector.extract_strided_slice %201 {offsets = [0, 0], sizes = [2, 8], strides = [1, 1]} : vector<2x16xf32> to vector<2x8xf32>
    %c0_202 = arith.constant 0 : index
    %c0_203 = arith.constant 0 : index
    %c32_204 = arith.constant 32 : index
    %203 = vector.load %arg5[%c0_202, %c0_203, %c32_204] : memref<1x2x128xf32, #tpu.memory_space<vmem>>, vector<1x2x8xf32>
    %204 = vector.shape_cast %203 : vector<1x2x8xf32> to vector<2x8xf32>
    %205 = vector.shape_cast %202 : vector<2x8xf32> to vector<1x2x8xf32>
    tpu.vector_store %arg5[%c0_202, %c0_203, %c32_204], %205 {strides = array<i32>} : memref<1x2x128xf32, #tpu.memory_space<vmem>>, vector<1x2x8xf32>,
    %206 = vector.extract_strided_slice %201 {offsets = [0, 8], sizes = [2, 8], strides = [1, 1]} : vector<2x16xf32> to vector<2x8xf32>
    %c0_205 = arith.constant 0 : index
    %c0_206 = arith.constant 0 : index
    %c96_207 = arith.constant 96 : index
    %207 = vector.load %arg5[%c0_205, %c0_206, %c96_207] : memref<1x2x128xf32, #tpu.memory_space<vmem>>, vector<1x2x8xf32>
    %208 = vector.shape_cast %207 : vector<1x2x8xf32> to vector<2x8xf32>
    %209 = vector.shape_cast %206 : vector<2x8xf32> to vector<1x2x8xf32>
    tpu.vector_store %arg5[%c0_205, %c0_206, %c96_207], %209 {strides = array<i32>} : memref<1x2x128xf32, #tpu.memory_space<vmem>>, vector<1x2x8xf32>,
    %c0_208 = arith.constant 0 : index
    %c2_209 = arith.constant 2 : index
    %c0_210 = arith.constant 0 : index
    %c5_211 = arith.constant 5 : index
    %c0_212 = arith.constant 0 : index
    %210 = vector.load %arg2[%c0_208, %c2_209, %c0_210, %c5_211, %c0_212] : memref<1x3x2x8x16xf32, #tpu.memory_space<vmem>>, vector<1x1x2x1x16xf32>
    %211 = vector.shape_cast %210 : vector<1x1x2x1x16xf32> to vector<2x16xf32>
    %212 = vector.extract_strided_slice %211 {offsets = [0, 0], sizes = [2, 8], strides = [1, 1]} : vector<2x16xf32> to vector<2x8xf32>
    %c0_213 = arith.constant 0 : index
    %c0_214 = arith.constant 0 : index
    %c40_215 = arith.constant 40 : index
    %213 = vector.load %arg5[%c0_213, %c0_214, %c40_215] : memref<1x2x128xf32, #tpu.memory_space<vmem>>, vector<1x2x8xf32>
    %214 = vector.shape_cast %213 : vector<1x2x8xf32> to vector<2x8xf32>
    %215 = vector.shape_cast %212 : vector<2x8xf32> to vector<1x2x8xf32>
    tpu.vector_store %arg5[%c0_213, %c0_214, %c40_215], %215 {strides = array<i32>} : memref<1x2x128xf32, #tpu.memory_space<vmem>>, vector<1x2x8xf32>,
    %216 = vector.extract_strided_slice %211 {offsets = [0, 8], sizes = [2, 8], strides = [1, 1]} : vector<2x16xf32> to vector<2x8xf32>
    %c0_216 = arith.constant 0 : index
    %c0_217 = arith.constant 0 : index
    %c104_218 = arith.constant 104 : index
    %217 = vector.load %arg5[%c0_216, %c0_217, %c104_218] : memref<1x2x128xf32, #tpu.memory_space<vmem>>, vector<1x2x8xf32>
    %218 = vector.shape_cast %217 : vector<1x2x8xf32> to vector<2x8xf32>
    %219 = vector.shape_cast %216 : vector<2x8xf32> to vector<1x2x8xf32>
    tpu.vector_store %arg5[%c0_216, %c0_217, %c104_218], %219 {strides = array<i32>} : memref<1x2x128xf32, #tpu.memory_space<vmem>>, vector<1x2x8xf32>,
    %c0_219 = arith.constant 0 : index
    %c2_220 = arith.constant 2 : index
    %c0_221 = arith.constant 0 : index
    %c6_222 = arith.constant 6 : index
    %c0_223 = arith.constant 0 : index
    %220 = vector.load %arg2[%c0_219, %c2_220, %c0_221, %c6_222, %c0_223] : memref<1x3x2x8x16xf32, #tpu.memory_space<vmem>>, vector<1x1x2x1x16xf32>
    %221 = vector.shape_cast %220 : vector<1x1x2x1x16xf32> to vector<2x16xf32>
    %222 = vector.extract_strided_slice %221 {offsets = [0, 0], sizes = [2, 8], strides = [1, 1]} : vector<2x16xf32> to vector<2x8xf32>
    %c0_224 = arith.constant 0 : index
    %c0_225 = arith.constant 0 : index
    %c48_226 = arith.constant 48 : index
    %223 = vector.load %arg5[%c0_224, %c0_225, %c48_226] : memref<1x2x128xf32, #tpu.memory_space<vmem>>, vector<1x2x8xf32>
    %224 = vector.shape_cast %223 : vector<1x2x8xf32> to vector<2x8xf32>
    %225 = vector.shape_cast %222 : vector<2x8xf32> to vector<1x2x8xf32>
    tpu.vector_store %arg5[%c0_224, %c0_225, %c48_226], %225 {strides = array<i32>} : memref<1x2x128xf32, #tpu.memory_space<vmem>>, vector<1x2x8xf32>,
    %226 = vector.extract_strided_slice %221 {offsets = [0, 8], sizes = [2, 8], strides = [1, 1]} : vector<2x16xf32> to vector<2x8xf32>
    %c0_227 = arith.constant 0 : index
    %c0_228 = arith.constant 0 : index
    %c112_229 = arith.constant 112 : index
    %227 = vector.load %arg5[%c0_227, %c0_228, %c112_229] : memref<1x2x128xf32, #tpu.memory_space<vmem>>, vector<1x2x8xf32>
    %228 = vector.shape_cast %227 : vector<1x2x8xf32> to vector<2x8xf32>
    %229 = vector.shape_cast %226 : vector<2x8xf32> to vector<1x2x8xf32>
    tpu.vector_store %arg5[%c0_227, %c0_228, %c112_229], %229 {strides = array<i32>} : memref<1x2x128xf32, #tpu.memory_space<vmem>>, vector<1x2x8xf32>,
    %c0_230 = arith.constant 0 : index
    %c2_231 = arith.constant 2 : index
    %c0_232 = arith.constant 0 : index
    %c7_233 = arith.constant 7 : index
    %c0_234 = arith.constant 0 : index
    %230 = vector.load %arg2[%c0_230, %c2_231, %c0_232, %c7_233, %c0_234] : memref<1x3x2x8x16xf32, #tpu.memory_space<vmem>>, vector<1x1x2x1x16xf32>
    %231 = vector.shape_cast %230 : vector<1x1x2x1x16xf32> to vector<2x16xf32>
    %232 = vector.extract_strided_slice %231 {offsets = [0, 0], sizes = [2, 8], strides = [1, 1]} : vector<2x16xf32> to vector<2x8xf32>
    %c0_235 = arith.constant 0 : index
    %c0_236 = arith.constant 0 : index
    %c56_237 = arith.constant 56 : index
    %233 = vector.load %arg5[%c0_235, %c0_236, %c56_237] : memref<1x2x128xf32, #tpu.memory_space<vmem>>, vector<1x2x8xf32>
    %234 = vector.shape_cast %233 : vector<1x2x8xf32> to vector<2x8xf32>
    %235 = vector.shape_cast %232 : vector<2x8xf32> to vector<1x2x8xf32>
    tpu.vector_store %arg5[%c0_235, %c0_236, %c56_237], %235 {strides = array<i32>} : memref<1x2x128xf32, #tpu.memory_space<vmem>>, vector<1x2x8xf32>,
    %236 = vector.extract_strided_slice %231 {offsets = [0, 8], sizes = [2, 8], strides = [1, 1]} : vector<2x16xf32> to vector<2x8xf32>
    %c0_238 = arith.constant 0 : index
    %c0_239 = arith.constant 0 : index
    %c120_240 = arith.constant 120 : index
    %237 = vector.load %arg5[%c0_238, %c0_239, %c120_240] : memref<1x2x128xf32, #tpu.memory_space<vmem>>, vector<1x2x8xf32>
    %238 = vector.shape_cast %237 : vector<1x2x8xf32> to vector<2x8xf32>
    %239 = vector.shape_cast %236 : vector<2x8xf32> to vector<1x2x8xf32>
    tpu.vector_store %arg5[%c0_238, %c0_239, %c120_240], %239 {strides = array<i32>} : memref<1x2x128xf32, #tpu.memory_space<vmem>>, vector<1x2x8xf32>,
    return
  }
  func.func @transform_0(%arg0: i32, %arg1: i32) -> (i32, i32, i32, i32, i32) {
    %c0_i32 = arith.constant 0 : i32
    %c0_i32_0 = arith.constant 0 : i32
    %c0_i32_1 = arith.constant 0 : i32
    %c0_i32_2 = arith.constant 0 : i32
    return %arg0, %c0_i32, %arg1, %c0_i32_0, %c0_i32_1 : i32, i32, i32, i32, i32
  }
  func.func @transform_1(%arg0: i32, %arg1: i32) -> (i32, i32, i32) {
    %c0_i32 = arith.constant 0 : i32
    %c0_i32_0 = arith.constant 0 : i32
    return %arg0, %arg1, %c0_i32 : i32, i32, i32
  }
  func.func @transform_2(%arg0: i32, %arg1: i32) -> (i32, i32, i32) {
    %c0_i32 = arith.constant 0 : i32
    %c0_i32_0 = arith.constant 0 : i32
    return %arg0, %arg1, %c0_i32 : i32, i32, i32
  }
  func.func @transform_3(%arg0: i32, %arg1: i32) -> (i32, i32, i32) {
    %c0_i32 = arith.constant 0 : i32
    %c0_i32_0 = arith.constant 0 : i32
    return %arg0, %arg1, %c0_i32 : i32, i32, i32
  }
}

</mosaic_0001>

<bundles_post_ra>
// kernel: ycbcr_space_forward.1
= control target key start
LH: loop header
LB: loop body
LE: loop exit
PB: predicated region body
PF: predicated region fallthrough
CT: control target
= control target key end

     0   :  { %9 = vsyncpa [#allocation3], 0  ;;  %s1319_s0 = inlined_call_operand.hbm [shape: f32[2,3,2,8,16], index: 0, kind: input, shape index: {}]   ;;  %s1320_s1 = inlined_call_operand.vmem [shape: f32[2,2,128], index: 1, kind: output, shape index: {0}]   ;;  %s1321_s2 = inlined_call_operand.vmem [shape: f32[2,2,128], index: 2, kind: output, shape index: {1}]   ;;  %s1322_s3 = inlined_call_operand.vmem [shape: f32[2,2,128], index: 3, kind: output, shape index: {2}]  }
   0x1   :  { %11 = vsyncpa [#allocation3 + $0x1], 0  ;;  %s1005_s12 = smov 0   ;;  %s1007_s13 = smov 0  }
   0x2   :  { %s1009_s14 = smov 0   ;;  %s1011_s15 = smov 0  }
   0x3   :  { %s1013_s16 = smov 0   ;;  %s1015_s17 = smov 0  }
   0x4 LB: > { %s770_s18 = sadd.s32 4294967295, %s967_s17   ;;  %s29_s19 = sadd.s32 1, %s963_s16  ;;  %s967_s17 = sphi %s1015_s17, %s17_s17   ;;  %s963_s16 = sphi %s1013_s16, %s1328_s16   ;;  %s959_s15 = sphi %s1011_s15, %s1327_s15   ;;  %s955_s14 = sphi %s1009_s14, %s1326_s14   ;;  %s951_s13 = sphi %s1007_s13, %s1325_s13   ;;  %s947_s12 = sphi %s1005_s12, %s1324_s12  }
   0x5   : > { %p31_p0 = scmp.ge.s32.totalorder %s29_s19, 2  ;;  %s38_s20 = sadd.s32 1, %s955_s14 }
   0x6   : > { %p45_p1 = scmp.ne.s32.totalorder %s955_s14, %s951_s13  ;;  %p46_p2 = scmp.eq.s32.totalorder %s967_s17, 0 }
   0x7   : > { %s1330_s19 = smov (%p31_p0, %s29_s19), 0  ;;  %p51_p4 = scmp.ne.s32.totalorder %s951_s13, %s947_s12 }
   0x8   : > { %p47_p3 = por %p46_p2, %p45_p1  ;;  %s33_s21 = ssub.s32 %s963_s16, %s1330_s19 }
   0x9   : > { %p52_p5 = scmp.eq.s32.totalorder %s770_s18, 0  ;;  %p36_p6 = scmp.eq.s32.totalorder %s33_s21, 0 }
   0xa   : > { %p822_p8 = scmp.lt.s32.totalorder %s967_s17, 2  ;;  %s159_s24 = sand.u32 1, %s955_s14  }
   0xb   : > { %p1044_p7 = por %p52_p5, %p51_p4  ;;  %s814_s25 = smul.u32 48, %s963_s16 }
   0xc   : > { %s1050_s23 = scalar_select %p36_p6, %s955_s14, %s38_s20  }
   0xd   : > { %s813_s26 = smul.u32 48, %s159_s24  ;;  %s170_s29 = scalar_lea.hbm %s1319_s0, %s814_s25 }
   0xe   : > { %p819_p9 = pnand %p822_p8, %p47_p3  ;;  %s171_s30 = sshll.u32 %s170_s29, 4  ;;  %s172_s30 = int_to_ptr.hbm [resolvable:$true] %s171_s30 }
   0xf   : > { %s163_s4 = scalar_lea.vmem [#allocation2], %s813_s26  ;;  %s160_s6 = scalar_lea.sflag [#allocation3], %s159_s24 }
  0x10   : > { %s173_s5 = sshll.u32 %s163_s4, 4  ;;  %s969_s7 = smov 128   ;;  %s174_s5 = int_to_ptr.vmem [resolvable:$true] %s173_s5 }
  0x11   : > { %s970_s8 = smov 8   ;;  %p775_p10 = scmp.ge.s32.totalorder %s967_s17, 1 }
  0x12   : > { %821 = dma.hbm_to_vmem [thread:$0]  (!%p819_p9), %s172_s30, 768, %s174_s5, %s160_s6, %s969_s7, %s969_s7, %s970_s8  }
  0x13   : > { %p181_p11 = scmp.lt.s32.totalorder %s967_s17, 3 }
  0x15   : > { %p182_p12 = pnand %p775_p10, %p181_p11 }
  0x16   : > { %s187_s9 = sand.u32 (!%p182_p12), 1, %s951_s13  }
  0x17   : > { %185 = sbr.rel (%p182_p12) target bundleno = 264 (0x108), region = 24  ;;  %s188_s11 = scalar_lea.sflag (!%p182_p12), [#allocation3], %s187_s9 }
  0x18   : > { %s815_s10 = smul.u32 (!%p182_p12), 48, %s187_s9 }
  0x1a   : > { %s1060_s12 = scalar_lea.vmem (!%p182_p12), [#allocation2], %s815_s10 }
  0x1c   : > { %942 = dma.done.wait (%p1044_p7), %s188_s11, 768  }
  0x1d   : > { %944 = vsyncadd (%p1044_p7), %s188_s11, 4294966528  ;;  %p232_p13 = scmp.lt.s32.totalorder %s959_s15, 1  ;;  %vm258_vm0 = vcmask 1041409   ;;  %v268_v0 = vld [vmem:[%s1060_s12 + $0x1] sm:$0x1]  ;;  %vm261_vm1 = vcmask 58368  }
  0x1e   : > { %v269_v1 = vld [vmem:[%s1060_s12 + $0x9] sm:$0x1]  ;;  %v253_v3 = vld [vmem:[%s1060_s12] sm:$0x1]  ;;  %v254_v4 = vld [vmem:[%s1060_s12 + $0x8] sm:$0x1] }
  0x1f   : > { %s1332_s15 = smov (!%p232_p13, %s959_s15), 1  ;;  %v272_v2 = vrot.slane %v269_v1, 7  ;;  %v257_v5 = vrot.slane %v254_v4, 7  ;;  %v284_v6 = vld [vmem:[%s1060_s12 + $0x2] sm:$0x1]  ;;  %s972_s24 = smov 56  }
  0x20   : > { %s1068_s18 = sshll.u32 %s1332_s15, 1  ;;  %v285_v7 = vld [vmem:[%s1060_s12 + $0xa] sm:$0x1]  ;;  %s971_s15 = smov 64   ;;  %v301_v12 = vld [vmem:[%s1060_s12 + $0xb] sm:$0x1] }
  0x21   : > { %s1078_s22 = scalar_lea.vmem %s1320_s1, %s1068_s18  ;;  %v273_v8 = vsel %vm258_vm0, %v272_v2, %v268_v0  ;;  %v288_v9 = vrot.slane %v285_v7, 7  ;;  %v259_v10 = vsel %vm258_vm0, %v257_v5, %v253_v3  ;;  %s973_s25 = smov 72   ;;  %v304_v13 = vrot.slane %v301_v12, 7  ;;  %v780_v14 = vld [vmem:[%s1060_s12 + $0x18] sm:$0x1] }
  0x22   : > { %279 = vrot.lane.b32.xlu1 %v273_v8, %s971_s15  ;;  %263 = vrot.lane.b32.xlu0 %v259_v10, %s972_s24  ;;  %262 = vst.msk [vmem:[%s1078_s22] sm:$0x3] %vm261_vm1, %v259_v10  ;;  %v317_v15 = vld [vmem:[%s1060_s12 + $0xc] sm:$0x1]  ;;  %s1098_s28 = scalar_lea.vmem %s1321_s2, %s1068_s18  ;;  %v385_v17 = vrot.slane %v780_v14, 7  ;;  %s974_s29 = smov 16  }
  0x23   : > { %v289_v11 = vsel %vm258_vm0, %v288_v9, %v284_v6  ;;  %v300_v16 = vld [vmem:[%s1060_s12 + $0x3] sm:$0x1]  ;;  %v779_v18 = vld [vmem:[%s1060_s12 + $0x10] sm:$0x1]  ;;  %s975_s30 = smov 8   ;;  %v320_v20 = vrot.slane %v317_v15, 7  ;;  %s1136_s27 = scalar_lea.vmem %s1322_s3, %s1068_s18 }
  0x24   : > { %295 = vrot.lane.b32.xlu2 %v289_v11, %s973_s25  ;;  %v386_v19 = vsel %vm258_vm0, %v385_v17, %v779_v18  ;;  %v305_v21 = vsel %vm258_vm0, %v304_v13, %v300_v16  ;;  %v316_v22 = vld [vmem:[%s1060_s12 + $0x4] sm:$0x1]  ;;  %s976_s4 = smov 24   ;;  %v333_v24 = vld [vmem:[%s1060_s12 + $0xd] sm:$0x1]  ;;  %s977_s5 = smov 32  }
  0x25   : > { %388 = vst.msk [vmem:[%s1098_s28] sm:$0x3] %vm261_vm1, %v386_v19  ;;  %v321_v23 = vsel %vm258_vm0, %v320_v20, %v316_v22  ;;  %s978_s6 = smov 80   ;;  %v336_v25 = vrot.slane %v333_v24, 7  ;;  %v332_v26 = vld [vmem:[%s1060_s12 + $0x5] sm:$0x1] }
  0x26   : > { %v349_v27 = vld [vmem:[%s1060_s12 + $0xe] sm:$0x1]  ;;  %s979_s7 = smov 88   ;;  %v365_v30 = vld [vmem:[%s1060_s12 + $0xf] sm:$0x1]  ;;  %s980_s8 = smov 96  }
  0x27   : > { %v337_v28 = vsel %vm258_vm0, %v336_v25, %v332_v26  ;;  %v352_v29 = vrot.slane %v349_v27, 7  ;;  %v348_v31 = vld [vmem:[%s1060_s12 + $0x6] sm:$0x1]  ;;  %s981_s9 = smov 40   ;;  %v368_v32 = vrot.slane %v365_v30, 7  ;;  %s982_s10 = smov 48  }
  0x28   : > { %v364_v34 = vld [vmem:[%s1060_s12 + $0x7] sm:$0x1]  ;;  %v782_v36 = vld [vmem:[%s1060_s12 + $0x19] sm:$0x1]  ;;  %s983_s11 = smov 104   ;;  %s984_s20 = smov 112  }
  0x29   : > { %v353_v33 = vsel %vm258_vm0, %v352_v29, %v348_v31  ;;  %v369_v35 = vsel %vm258_vm0, %v368_v32, %v364_v34  ;;  %v397_v37 = vrot.slane %v782_v36, 7  ;;  %v795_v38 = vld [vmem:[%s1060_s12 + $0x20] sm:$0x1]  ;;  %v796_v39 = vld [vmem:[%s1060_s12 + $0x28] sm:$0x1]  ;;  %vm266_vm2 = vcmask 583168  }
  0x2a   : > { %290 = vrot.lane.b32.xlu1 %v289_v11, %s974_s29  ;;  %274 = vrot.lane.b32.xlu0 %v273_v8, %s975_s30  ;;  %v781_v40 = vld [vmem:[%s1060_s12 + $0x11] sm:$0x1]  ;;  %v496_v41 = vrot.slane %v796_v39, 7  ;;  %v784_v44 = vld [vmem:[%s1060_s12 + $0x1a] sm:$0x1]  ;;  %vm277_vm3 = vcmask 123968  }
  0x2b   : > { %v398_v43 = vsel %vm258_vm0, %v397_v37, %v781_v40  ;;  %v411_v45 = vrot.slane %v784_v44, 7  ;;  %v783_v46 = vld [vmem:[%s1060_s12 + $0x12] sm:$0x1]  ;;  %v786_v47 = vld [vmem:[%s1060_s12 + $0x1b] sm:$0x1]  ;;  %vm282_vm4 = vcmask 648768  }
  0x2c   : > { %306 = vrot.lane.b32.xlu2 %v305_v21, %s976_s4  ;;  %v497_v42 = vsel %vm258_vm0, %v496_v41, %v795_v38  ;;  %v425_v49 = vrot.slane %v786_v47, 7  ;;  %v788_v50 = vld [vmem:[%s1060_s12 + $0x1c] sm:$0x1]  ;;  %v785_v51 = vld [vmem:[%s1060_s12 + $0x13] sm:$0x1]  ;;  %vm293_vm5 = vcmask 189568  }
  0x2d   : > { %499 = vst.msk [vmem:[%s1136_s27] sm:$0x3] %vm261_vm1, %v497_v42  ;;  %v412_v48 = vsel %vm258_vm0, %v411_v45, %v783_v46  ;;  %v439_v52 = vrot.slane %v788_v50, 7  ;;  %v787_v54 = vld [vmem:[%s1060_s12 + $0x14] sm:$0x1]  ;;  %vm298_vm6 = vcmask 714368  }
  0x2e   : > { %v426_v53 = vsel %vm258_vm0, %v425_v49, %v785_v51  ;;  %v790_v56 = vld [vmem:[%s1060_s12 + $0x1d] sm:$0x1]  ;;  %v789_v58 = vld [vmem:[%s1060_s12 + $0x15] sm:$0x1]  ;;  %v792_v59 = vld [vmem:[%s1060_s12 + $0x1e] sm:$0x1] }
  0x2f   : > { %v440_v55 = vsel %vm258_vm0, %v439_v52, %v787_v54  ;;  %v453_v57 = vrot.slane %v790_v56, 7  ;;  %v467_v61 = vrot.slane %v792_v59, 7  ;;  %v791_v62 = vld [vmem:[%s1060_s12 + $0x16] sm:$0x1]  ;;  %v798_v0 = vld [vmem:[%s1060_s12 + $0x29] sm:$0x1] }
  0x30   : > { %v508_v1 = vrot.slane %v798_v0, 7  ;;  %v797_v2 = vld [vmem:[%s1060_s12 + $0x21] sm:$0x1]  ;;  %v800_v3 = vld [vmem:[%s1060_s12 + $0x2a] sm:$0x1]  ;;  %vm309_vm7 = vcmask 255168  }
  0x31   : > { %v454_v60 = vsel %vm258_vm0, %v453_v57, %v789_v58  ;;  %v468_v63 = vsel %vm258_vm0, %v467_v61, %v791_v62  ;;  %v522_v5 = vrot.slane %v800_v3, 7  ;;  %v799_v6 = vld [vmem:[%s1060_s12 + $0x22] sm:$0x1]  ;;  %v802_v8 = vld [vmem:[%s1060_s12 + $0x2b] sm:$0x1]  ;;  %vm314_vm8 = vcmask 779968  }
  0x32   : > { %322 = vrot.lane.b32.xlu1 %v321_v23, %s977_s5  ;;  %311 = vrot.lane.b32.xlu0 %v305_v21, %s978_s6  ;;  %v509_v4 = vsel %vm258_vm0, %v508_v1, %v797_v2  ;;  %v536_v9 = vrot.slane %v802_v8, 7  ;;  %v801_v10 = vld [vmem:[%s1060_s12 + $0x23] sm:$0x1]  ;;  %v804_v11 = vld [vmem:[%s1060_s12 + $0x2c] sm:$0x1]  ;;  %vm325_vm9 = vcmask 320768  }
  0x33   : > { %v523_v7 = vsel %vm258_vm0, %v522_v5, %v799_v6  ;;  %v550_v13 = vrot.slane %v804_v11, 7  ;;  %v803_v14 = vld [vmem:[%s1060_s12 + $0x24] sm:$0x1]  ;;  %v806_v15 = vld [vmem:[%s1060_s12 + $0x2d] sm:$0x1]  ;;  %vm330_vm10 = vcmask 845568  }
  0x34   : > { %327 = vrot.lane.b32.xlu2 %v321_v23, %s979_s7  ;;  %v537_v12 = vsel %vm258_vm0, %v536_v9, %v801_v10  ;;  %v564_v17 = vrot.slane %v806_v15, 7  ;;  %v805_v18 = vld [vmem:[%s1060_s12 + $0x25] sm:$0x1]  ;;  %v808_v21 = vld [vmem:[%s1060_s12 + $0x2e] sm:$0x1]  ;;  %vm341_vm11 = vcmask 386368  }
  0x35   : > { %v551_v16 = vsel %vm258_vm0, %v550_v13, %v803_v14  ;;  %v578_v22 = vrot.slane %v808_v21, 7  ;;  %v807_v23 = vld [vmem:[%s1060_s12 + $0x26] sm:$0x1]  ;;  %v794_v24 = vld [vmem:[%s1060_s12 + $0x1f] sm:$0x1]  ;;  %vm346_vm12 = vcmask 911168  }
  0x36   : > { %v565_v20 = vsel %vm258_vm0, %v564_v17, %v805_v18  ;;  %v481_v27 = vrot.slane %v794_v24, 7  ;;  %v810_v29 = vld [vmem:[%s1060_s12 + $0x2f] sm:$0x1]  ;;  %v809_v32 = vld [vmem:[%s1060_s12 + $0x27] sm:$0x1]  ;;  %vm357_vm13 = vcmask 451968  }
  0x37   : > { %v579_v26 = vsel %vm258_vm0, %v578_v22, %v807_v23  ;;  %v592_v31 = vrot.slane %v810_v29, 7  ;;  %vm362_vm14 = vcmask 976768   ;;  %vm373_vm15 = vcmask 517568  }
  0x39   : > { %v593_v34 = vsel %vm258_vm0, %v592_v31, %v809_v32 }
  0x3a   : > { %343 = vrot.lane.b32.xlu1 %v337_v28, %s980_s8  ;;  %338 = vrot.lane.b32.xlu0 %v337_v28, %s981_s9  ;;  %v793_v28 = vld [vmem:[%s1060_s12 + $0x17] sm:$0x1] }
  0x3b   : > { %v482_v30 = vsel %vm258_vm0, %v481_v27, %v793_v28  ;;  %vm378_vm0 = vcmask 1042368  }
  0x3c   : > { %354 = vrot.lane.b32.xlu2 %v353_v33, %s982_s10 }
  0x42   : > { %370 = vrot.lane.b32.xlu1 %v369_v35, %s972_s24  ;;  %359 = vrot.lane.b32.xlu0 %v353_v33, %s983_s11 }
  0x44   : > { %375 = vrot.lane.b32.xlu2 %v369_v35, %s984_s20 }
  0x4a   : > { %399 = vrot.lane.b32.xlu1 %v398_v43, %s975_s30  ;;  %389 = vrot.lane.b32.xlu0 %v386_v19, %s972_s24 }
  0x4c   : > { %403 = vrot.lane.b32.xlu2 %v398_v43, %s971_s15 }
  0x52   : > { %417 = vrot.lane.b32.xlu1 %v412_v48, %s973_s25  ;;  %413 = vrot.lane.b32.xlu0 %v412_v48, %s974_s29 }
  0x54   : > { %427 = vrot.lane.b32.xlu2 %v426_v53, %s976_s4 }
  0x5a   : > { %441 = vrot.lane.b32.xlu1 %v440_v55, %s977_s5  ;;  %431 = vrot.lane.b32.xlu0 %v426_v53, %s978_s6 }
  0x5c   : > { %445 = vrot.lane.b32.xlu2 %v440_v55, %s979_s7 }
  0x62   : > { %459 = vrot.lane.b32.xlu1 %v454_v60, %s980_s8  ;;  %455 = vrot.lane.b32.xlu0 %v454_v60, %s981_s9 }
  0x64   : > { %469 = vrot.lane.b32.xlu2 %v468_v63, %s982_s10 }
  0x6a   : > { %500 = vrot.lane.b32.xlu1 %v497_v42, %s972_s24  ;;  %473 = vrot.lane.b32.xlu0 %v468_v63, %s983_s11 }
  0x6c   : > { %510 = vrot.lane.b32.xlu2 %v509_v4, %s975_s30 }
  0x72   : > { %524 = vrot.lane.b32.xlu1 %v523_v7, %s974_s29  ;;  %514 = vrot.lane.b32.xlu0 %v509_v4, %s971_s15 }
  0x74   : > { %528 = vrot.lane.b32.xlu2 %v523_v7, %s973_s25 }
  0x7a   : > { %542 = vrot.lane.b32.xlu1 %v537_v12, %s978_s6  ;;  %538 = vrot.lane.b32.xlu0 %v537_v12, %s976_s4 }
  0x7c   : > { %552 = vrot.lane.b32.xlu2 %v551_v16, %s977_s5 }
  0x7e   : > { %v296_v19 = vpop.permute.xlu2 %295 }
  0x82   : > { %566 = vrot.lane.b32.xlu1 %v565_v20, %s981_s9  ;;  %556 = vrot.lane.b32.xlu0 %v551_v16, %s979_s7 }
  0x84   : > { %570 = vrot.lane.b32.xlu2 %v565_v20, %s980_s8 }
  0x86   : > { %v307_v25 = vpop.permute.xlu2 %306 }
  0x8a   : > { %584 = vrot.lane.b32.xlu1 %v579_v26, %s983_s11  ;;  %580 = vrot.lane.b32.xlu0 %v579_v26, %s982_s10 }
  0x8c   : > { %483 = vrot.lane.b32.xlu2 %v482_v30, %s972_s24 }
  0x8e   : > { %v328_v33 = vpop.permute.xlu2 %327 }
  0x92   : > { %487 = vrot.lane.b32.xlu1 %v482_v30, %s984_s20  ;;  %594 = vrot.lane.b32.xlu0 %v593_v34, %s972_s24 }
  0x94   : > { %v280_v35 = vpop.permute.xlu1 %279  ;;  %598 = vrot.lane.b32.xlu2 %v593_v34, %s984_s20  ;;  %v264_v36 = vpop.permute.xlu0 %263 }
  0x95   : > { %267 = vst.msk [vmem:[%s1078_s22] sm:$0x3] %vm266_vm2, %v264_v36 }
  0x96   : > { %v355_v37 = vpop.permute.xlu2 %354 }
  0x9c   : > { %v291_v38 = vpop.permute.xlu1 %290  ;;  %v275_v39 = vpop.permute.xlu0 %274 }
  0x9d   : > { %278 = vst.msk [vmem:[%s1078_s22] sm:$0x3] %vm277_vm3, %v275_v39 }
  0x9e   : > { %v376_v40 = vpop.permute.xlu2 %375  ;;  %283 = vst.msk [vmem:[%s1078_s22] sm:$0x3] %vm282_vm4, %v280_v35 }
  0x9f   : > { %294 = vst.msk [vmem:[%s1078_s22] sm:$0x3] %vm293_vm5, %v291_v38 }
  0xa0   : > { %299 = vst.msk [vmem:[%s1078_s22] sm:$0x3] %vm298_vm6, %v296_v19 }
  0xa1   : > { %310 = vst.msk [vmem:[%s1078_s22] sm:$0x3] %vm309_vm7, %v307_v25 }
  0xa4   : > { %v323_v41 = vpop.permute.xlu1 %322  ;;  %v312_v42 = vpop.permute.xlu0 %311 }
  0xa5   : > { %315 = vst.msk [vmem:[%s1078_s22] sm:$0x3] %vm314_vm8, %v312_v42 }
  0xa6   : > { %v404_v43 = vpop.permute.xlu2 %403  ;;  %326 = vst.msk [vmem:[%s1078_s22] sm:$0x3] %vm325_vm9, %v323_v41 }
  0xa7   : > { %331 = vst.msk [vmem:[%s1078_s22] sm:$0x3] %vm330_vm10, %v328_v33 }
  0xac   : > { %v344_v44 = vpop.permute.xlu1 %343  ;;  %v339_v45 = vpop.permute.xlu0 %338 }
  0xad   : > { %342 = vst.msk [vmem:[%s1078_s22] sm:$0x3] %vm341_vm11, %v339_v45 }
  0xae   : > { %v428_v46 = vpop.permute.xlu2 %427  ;;  %347 = vst.msk [vmem:[%s1078_s22] sm:$0x3] %vm346_vm12, %v344_v44 }
  0xaf   : > { %358 = vst.msk [vmem:[%s1078_s22] sm:$0x3] %vm357_vm13, %v355_v37 }
  0xb4   : > { %v371_v47 = vpop.permute.xlu1 %370  ;;  %v360_v48 = vpop.permute.xlu0 %359 }
  0xb5   : > { %363 = vst.msk [vmem:[%s1078_s22] sm:$0x3] %vm362_vm14, %v360_v48 }
  0xb6   : > { %v446_v49 = vpop.permute.xlu2 %445  ;;  %374 = vst.msk [vmem:[%s1078_s22] sm:$0x3] %vm373_vm15, %v371_v47 }
  0xb7   : > { %379 = vst.msk [vmem:[%s1078_s22] sm:$0x3] %vm378_vm0, %v376_v40 }
  0xbc   : > { %v400_v50 = vpop.permute.xlu1 %399  ;;  %v390_v51 = vpop.permute.xlu0 %389 }
  0xbd   : > { %392 = vst.msk [vmem:[%s1098_s28] sm:$0x3] %vm266_vm2, %v390_v51 }
  0xbe   : > { %v470_v52 = vpop.permute.xlu2 %469  ;;  %402 = vst.msk [vmem:[%s1098_s28] sm:$0x3] %vm277_vm3, %v400_v50 }
  0xbf   : > { %406 = vst.msk [vmem:[%s1098_s28] sm:$0x3] %vm282_vm4, %v404_v43 }
  0xc4   : > { %v418_v53 = vpop.permute.xlu1 %417  ;;  %v414_v54 = vpop.permute.xlu0 %413 }
  0xc5   : > { %416 = vst.msk [vmem:[%s1098_s28] sm:$0x3] %vm293_vm5, %v414_v54 }
  0xc6   : > { %v511_v55 = vpop.permute.xlu2 %510  ;;  %420 = vst.msk [vmem:[%s1098_s28] sm:$0x3] %vm298_vm6, %v418_v53 }
  0xc7   : > { %430 = vst.msk [vmem:[%s1098_s28] sm:$0x3] %vm309_vm7, %v428_v46 }
  0xcc   : > { %v442_v56 = vpop.permute.xlu1 %441  ;;  %v432_v57 = vpop.permute.xlu0 %431 }
  0xcd   : > { %434 = vst.msk [vmem:[%s1098_s28] sm:$0x3] %vm314_vm8, %v432_v57 }
  0xce   : > { %v529_v58 = vpop.permute.xlu2 %528  ;;  %444 = vst.msk [vmem:[%s1098_s28] sm:$0x3] %vm325_vm9, %v442_v56 }
  0xcf   : > { %448 = vst.msk [vmem:[%s1098_s28] sm:$0x3] %vm330_vm10, %v446_v49 }
  0xd4   : > { %v460_v59 = vpop.permute.xlu1 %459  ;;  %v456_v60 = vpop.permute.xlu0 %455 }
  0xd5   : > { %458 = vst.msk [vmem:[%s1098_s28] sm:$0x3] %vm341_vm11, %v456_v60 }
  0xd6   : > { %v553_v61 = vpop.permute.xlu2 %552  ;;  %462 = vst.msk [vmem:[%s1098_s28] sm:$0x3] %vm346_vm12, %v460_v59 }
  0xd7   : > { %472 = vst.msk [vmem:[%s1098_s28] sm:$0x3] %vm357_vm13, %v470_v52 }
  0xdc   : > { %v501_v62 = vpop.permute.xlu1 %500  ;;  %v474_v63 = vpop.permute.xlu0 %473 }
  0xdd   : > { %503 = vst.msk [vmem:[%s1136_s27] sm:$0x3] %vm266_vm2, %v501_v62 }
  0xde   : > { %476 = vst.msk [vmem:[%s1098_s28] sm:$0x3] %vm362_vm14, %v474_v63  ;;  %v571_v0 = vpop.permute.xlu2 %570 }
  0xdf   : > { %513 = vst.msk [vmem:[%s1136_s27] sm:$0x3] %vm277_vm3, %v511_v55 }
  0xe4   : > { %v525_v1 = vpop.permute.xlu1 %524  ;;  %v515_v2 = vpop.permute.xlu0 %514 }
  0xe5   : > { %517 = vst.msk [vmem:[%s1136_s27] sm:$0x3] %vm282_vm4, %v515_v2 }
  0xe6   : > { %v484_v3 = vpop.permute.xlu2 %483  ;;  %527 = vst.msk [vmem:[%s1136_s27] sm:$0x3] %vm293_vm5, %v525_v1 }
  0xe7   : > { %531 = vst.msk [vmem:[%s1136_s27] sm:$0x3] %vm298_vm6, %v529_v58 }
  0xe8   : > { %486 = vst.msk [vmem:[%s1098_s28] sm:$0x3] %vm373_vm15, %v484_v3 }
  0xec   : > { %v543_v4 = vpop.permute.xlu1 %542  ;;  %v539_v5 = vpop.permute.xlu0 %538 }
  0xed   : > { %541 = vst.msk [vmem:[%s1136_s27] sm:$0x3] %vm309_vm7, %v539_v5 }
  0xee   : > { %545 = vst.msk [vmem:[%s1136_s27] sm:$0x3] %vm314_vm8, %v543_v4  ;;  %v599_v10 = vpop.permute.xlu2 %598 }
  0xef   : > { %555 = vst.msk [vmem:[%s1136_s27] sm:$0x3] %vm325_vm9, %v553_v61 }
  0xf4   : > { %v567_v6 = vpop.permute.xlu1 %566  ;;  %v557_v7 = vpop.permute.xlu0 %556 }
  0xf5   : > { %559 = vst.msk [vmem:[%s1136_s27] sm:$0x3] %vm330_vm10, %v557_v7 }
  0xf6   : > { %569 = vst.msk [vmem:[%s1136_s27] sm:$0x3] %vm341_vm11, %v567_v6 }
  0xf7   : > { %573 = vst.msk [vmem:[%s1136_s27] sm:$0x3] %vm346_vm12, %v571_v0 }
  0xfc   : > { %v585_v8 = vpop.permute.xlu1 %584  ;;  %v581_v9 = vpop.permute.xlu0 %580 }
  0xfd   : > { %583 = vst.msk [vmem:[%s1136_s27] sm:$0x3] %vm357_vm13, %v581_v9 }
  0xfe   : > { %587 = vst.msk [vmem:[%s1136_s27] sm:$0x3] %vm362_vm14, %v585_v8 }
 0x104   : > { %v488_v11 = vpop.permute.xlu1 %487  ;;  %v595_v12 = vpop.permute.xlu0 %594 }
 0x105   : > { %490 = vst.msk [vmem:[%s1098_s28] sm:$0x3] %vm378_vm0, %v488_v11 }
 0x106   : > { %597 = vst.msk [vmem:[%s1136_s27] sm:$0x3] %vm373_vm15, %v595_v12 }
 0x107   : > { %601 = vst.msk [vmem:[%s1136_s27] sm:$0x3] %vm378_vm0, %v599_v10 }
 0x108 PF: > { %s17_s17 = sadd.s32 1, %s967_s17   ;;  %s1324_s12 = smov %s951_s13 }
 0x109   : > { %p14_p0 = scmp.ge.s32.totalorder %s17_s17, 4   ;;  %s1325_s13 = smov %s955_s14 }
 0x10a   : > { %s1326_s14 = smov %s1050_s23  ;;  %s1327_s15 = smov %s963_s16 }
 0x10b   : > { %s1328_s16 = smov %s1330_s19  ;;  %16 = sbr.rel (!%p14_p0) target bundleno = 4 (0x4), region = 90 }
 0x110   :  { %667 = vsyncpa [#allocation3], 1 }
 0x111   :  { %669 = vsyncpa [#allocation3 + $0x1], 1 }

</bundles_post_ra>
